<compile_context>
chip_gen: v5e
topology: v5e:2x2
jax: 0.10.0
libtpu: 0.0.40
codegen_flags: <defaults>
</compile_context>

<pallas_src>
import jax
import jax.numpy as jnp
from jax.experimental import pallas as pl
from jax.experimental.pallas import tpu as pltpu

NUM_TYPES = 17


def _round_up(a, b):
    return (a + b - 1) // b * b


def _type_aware_kernel(acts_ref, types_ref, lane_ref, w_ref, fold_ref, out_ref):
    # Single K = (d_x + d_e + 1) MXU call evaluates all 17 linear layers at
    # once (bias folded in via the ones column of acts); result is type-major
    # [tile_n, 17*out_dim] and is consumed immediately by the fold matmul.
    y = jnp.dot(acts_ref[...], w_ref[...], preferred_element_type=jnp.float32)

    # Per-node type selection: one compare + one select over the wide result
    # (lane_ref[0, j] == j // out_dim, precomputed in the wrapper).
    keep = lane_ref[...] == types_ref[...]            # [tile_n, 17*out] broadcast
    masked = jnp.where(keep, y, 0.0)

    # 0/1 fold matmul collapses the masked wide result to [tile_n, out_dim]
    # (K = 17*out_dim; replaces 17 lane-unaligned slices + selects + adds).
    sel = jnp.dot(masked, fold_ref[...], preferred_element_type=jnp.float32)

    out_ref[...] = jnp.maximum(sel, 0.0)              # ReLU on the narrow result


def fuse_params(weights, biases):
    """One-time (init-time) parameter fusion.

    weights: [17, input_dim, output_dim] f32, biases: [17, output_dim] f32
    Returns:
      w_full: [input_dim + 1, 17*output_dim]  (type-major, bias as last row)
      fold:   [17*output_dim, output_dim]     (0/1 fold matrix)
      lane_type: [1, 17*output_dim] int32     (per-lane type id)
    """
    w = weights.astype(jnp.float32)
    n_types, d_in, out_dim = w.shape
    wide = n_types * out_dim
    wt = jnp.transpose(w, (1, 0, 2)).reshape(d_in, wide)          # [d_in, 17*out]
    bt = biases.astype(jnp.float32).reshape(1, wide)              # [1,    17*out]
    w_full = jnp.concatenate([wt, bt], axis=0)                    # [d_in+1, 17*out]
    fold = jnp.tile(jnp.eye(out_dim, dtype=jnp.float32), (n_types, 1))  # [17*out, out]
    lane_type = (jnp.arange(wide, dtype=jnp.int32) // out_dim).reshape(1, wide)
    return w_full, fold, lane_type


def type_aware_node_update(x, edge_attr, node_types, w_full, fold, lane_type,
                           *, tile_n_max=1024):
    """x: [N, d_x] f32, edge_attr: [N, d_e] f32, node_types: [N] int,
    (w_full, fold, lane_type) from fuse_params()."""
    x = x.astype(jnp.float32)
    e = edge_attr.astype(jnp.float32)
    n = x.shape[0]
    d_in1 = w_full.shape[0]                     # d_x + d_e + 1 (ones column)
    wide = w_full.shape[1]                      # 17 * out_dim
    out_dim = fold.shape[1]

    # Pack activations once; the trailing ones column folds the bias into the
    # fused matmul (the tiny HBM round trip is negligible vs. split-K pushes).
    acts = jnp.concatenate([x, e, jnp.ones((n, 1), jnp.float32)], axis=1)
    assert acts.shape[1] == d_in1

    # Tile over nodes: big tiles amortize per-step overhead, but keep >= 2
    # grid steps when possible so v7x's two TensorCores both get work.
    n8 = _round_up(max(n, 1), 8)
    if n8 > 8:
        tile_n = min(tile_n_max, _round_up((n8 + 1) // 2, 8))
    else:
        tile_n = 8
    tile_n = max(8, tile_n)
    n_pad = _round_up(n, tile_n)
    pad = n_pad - n

    types = node_types.astype(jnp.int32)
    if pad:
        acts = jnp.pad(acts, ((0, pad), (0, 0)))
        types = jnp.pad(types, (0, pad), constant_values=NUM_TYPES)  # no match -> 0
    types = types.reshape(n_pad, 1)

    out = pl.pallas_call(
        _type_aware_kernel,
        out_shape=jax.ShapeDtypeStruct((n_pad, out_dim), jnp.float32),
        grid_spec=pltpu.PrefetchScalarGridSpec(
            num_scalar_prefetch=0,
            grid=(n_pad // tile_n,),
            in_specs=[
                pl.BlockSpec((tile_n, d_in1), lambda i: (i, 0)),   # packed acts
                pl.BlockSpec((tile_n, 1), lambda i: (i, 0)),       # node types
                pl.BlockSpec((1, wide), lambda i: (0, 0)),         # resident lane ids
                pl.BlockSpec((d_in1, wide), lambda i: (0, 0)),     # resident fused W+b
                pl.BlockSpec((wide, out_dim), lambda i: (0, 0)),   # resident fold
            ],
            out_specs=pl.BlockSpec((tile_n, out_dim), lambda i: (i, 0)),
        ),
        compiler_params=pltpu.CompilerParams(
            dimension_semantics=("parallel",),
            vmem_limit_bytes=48 * 1024 * 1024,
        ),
    )(acts, types, lane_type, w_full, fold)
    return out[:n]


def _reference(x, edge_attr, node_types, weights, biases):
    inp = jnp.concatenate([x, edge_attr], axis=1).astype(jnp.float32)
    out = jnp.zeros((inp.shape[0], weights.shape[-1]), jnp.float32)
    for i in range(NUM_TYPES):
        y = jnp.dot(inp, weights[i], precision=jax.lax.Precision.HIGHEST) + biases[i]
        y = jnp.maximum(y, 0.0)
        out = jnp.where((node_types == i)[:, None], y, out)
    return out


if __name__ == "__main__":
    key = jax.random.PRNGKey(0)
    k_x, k_e, k_t, k_w, k_b = jax.random.split(key, 5)

    N = 32            # nodes
    d_x, d_e = 8, 8   # node / edge feature dims
    input_dim = d_x + d_e
    output_dim = 32

    x = jax.random.normal(k_x, (N, d_x), dtype=jnp.float32)
    edge_attr = jax.random.normal(k_e, (N, d_e), dtype=jnp.float32)
    node_types = jax.random.randint(k_t, (N,), 0, NUM_TYPES, dtype=jnp.int32)

    # Deterministic synthetic parameters (shapes match the 17 nn.Linear layers).
    weights = 0.1 * jax.random.normal(
        k_w, (NUM_TYPES, input_dim, output_dim), dtype=jnp.float32)
    biases = 0.1 * jax.random.normal(
        k_b, (NUM_TYPES, output_dim), dtype=jnp.float32)

    # One-time parameter fusion (init-time, not per call).
    w_full, fold, lane_type = fuse_params(weights, biases)

    out = type_aware_node_update(x, edge_attr, node_types, w_full, fold, lane_type)
    out = jax.block_until_ready(out)

    ref = _reference(x, edge_attr, node_types, weights, biases)
    assert out.shape == (N, output_dim) and out.dtype == jnp.float32
    assert jnp.allclose(out, ref, atol=1e-4, rtol=1e-4), \
        float(jnp.max(jnp.abs(out - ref)))

    print("KERNEL_OK")
</pallas_src>

<mosaic_0001>
module attributes {stable_mosaic.version = 11 : i64} {
  func.func @_type_aware_kernel(%arg0: i32, %arg1: memref<16x17xf32, #tpu.memory_space<vmem>>, %arg2: memref<16x1xi32, #tpu.memory_space<vmem>>, %arg3: memref<1x544xi32, #tpu.memory_space<vmem>>, %arg4: memref<17x544xf32, #tpu.memory_space<vmem>>, %arg5: memref<544x32xf32, #tpu.memory_space<vmem>>, %arg6: memref<16x32xf32, #tpu.memory_space<vmem>>) attributes {dimension_semantics = [#tpu.dimension_semantics<parallel>], iteration_bounds = array<i64: 2>, scalar_prefetch = 0 : i64, scratch_operands = 0 : i64, tpu.core_type = #tpu.core_type<tc>, window_params = [{transform_indices = @transform_0, window_bounds = array<i64: 16, 17>}, {transform_indices = @transform_1, window_bounds = array<i64: 16, 1>}, {pipeline_mode = #tpu.pipeline_mode<synchronous>, transform_indices = @transform_2, window_bounds = array<i64: 1, 544>}, {pipeline_mode = #tpu.pipeline_mode<synchronous>, transform_indices = @transform_3, window_bounds = array<i64: 17, 544>}, {pipeline_mode = #tpu.pipeline_mode<synchronous>, transform_indices = @transform_4, window_bounds = array<i64: 544, 32>}, {transform_indices = @transform_5, window_bounds = array<i64: 16, 32>}]} {
    %c0 = arith.constant 0 : index
    %c0_0 = arith.constant 0 : index
    %0 = vector.load %arg1[%c0, %c0_0] : memref<16x17xf32, #tpu.memory_space<vmem>>, vector<16x17xf32>
    %c0_1 = arith.constant 0 : index
    %c0_2 = arith.constant 0 : index
    %1 = vector.load %arg4[%c0_1, %c0_2] : memref<17x544xf32, #tpu.memory_space<vmem>>, vector<17x544xf32>
    %cst = arith.constant dense<0.000000e+00> : vector<16x544xf32>
    %2 = tpu.matmul %0, %1, %cst {dimension_numbers = #tpu.dot_dimension_numbers<[1], [0], [0], [1], [0, 0, 1, 1], [], []>} : vector<16x17xf32>, vector<17x544xf32>, vector<16x544xf32> -> vector<16x544xf32>
    %c0_3 = arith.constant 0 : index
    %c0_4 = arith.constant 0 : index
    %3 = vector.load %arg3[%c0_3, %c0_4] : memref<1x544xi32, #tpu.memory_space<vmem>>, vector<1x544xi32>
    %c0_5 = arith.constant 0 : index
    %c0_6 = arith.constant 0 : index
    %4 = vector.load %arg2[%c0_5, %c0_6] : memref<16x1xi32, #tpu.memory_space<vmem>>, vector<16x1xi32>
    %5 = vector.broadcast %3 : vector<1x544xi32> to vector<16x544xi32>
    %6 = vector.broadcast %4 : vector<16x1xi32> to vector<16x544xi32>
    %7 = arith.cmpi eq, %5, %6 : vector<16x544xi32>
    %cst_7 = arith.constant 0.000000e+00 : f32
    %8 = vector.broadcast %cst_7 : f32 to vector<16x544xf32>
    %9 = arith.select %7, %2, %8 : vector<16x544xi1>, vector<16x544xf32>
    %c0_8 = arith.constant 0 : index
    %c0_9 = arith.constant 0 : index
    %10 = vector.load %arg5[%c0_8, %c0_9] : memref<544x32xf32, #tpu.memory_space<vmem>>, vector<544x32xf32>
    %cst_10 = arith.constant dense<0.000000e+00> : vector<16x32xf32>
    %11 = tpu.matmul %9, %10, %cst_10 {dimension_numbers = #tpu.dot_dimension_numbers<[1], [0], [0], [1], [0, 0, 1, 1], [], []>} : vector<16x544xf32>, vector<544x32xf32>, vector<16x32xf32> -> vector<16x32xf32>
    %cst_11 = arith.constant 0.000000e+00 : f32
    %12 = vector.broadcast %cst_11 : f32 to vector<16x32xf32>
    %13 = arith.maximumf %11, %12 : vector<16x32xf32>
    %c0_12 = arith.constant 0 : index
    %c0_13 = arith.constant 0 : index
    %14 = vector.load %arg6[%c0_12, %c0_13] : memref<16x32xf32, #tpu.memory_space<vmem>>, vector<16x32xf32>
    tpu.vector_store %arg6[%c0_12, %c0_13], %13 {strides = array<i32>} : memref<16x32xf32, #tpu.memory_space<vmem>>, vector<16x32xf32>,
    return
  }
  func.func @transform_0(%arg0: i32) -> (i32, i32) {
    %c0_i32 = arith.constant 0 : i32
    %c0_i32_0 = arith.constant 0 : i32
    return %arg0, %c0_i32 : i32, i32
  }
  func.func @transform_1(%arg0: i32) -> (i32, i32) {
    %c0_i32 = arith.constant 0 : i32
    %c0_i32_0 = arith.constant 0 : i32
    return %arg0, %c0_i32 : i32, i32
  }
  func.func @transform_2(%arg0: i32) -> (i32, i32) {
    %c0_i32 = arith.constant 0 : i32
    %c0_i32_0 = arith.constant 0 : i32
    %c0_i32_1 = arith.constant 0 : i32
    return %c0_i32, %c0_i32_0 : i32, i32
  }
  func.func @transform_3(%arg0: i32) -> (i32, i32) {
    %c0_i32 = arith.constant 0 : i32
    %c0_i32_0 = arith.constant 0 : i32
    %c0_i32_1 = arith.constant 0 : i32
    return %c0_i32, %c0_i32_0 : i32, i32
  }
  func.func @transform_4(%arg0: i32) -> (i32, i32) {
    %c0_i32 = arith.constant 0 : i32
    %c0_i32_0 = arith.constant 0 : i32
    %c0_i32_1 = arith.constant 0 : i32
    return %c0_i32, %c0_i32_0 : i32, i32
  }
  func.func @transform_5(%arg0: i32) -> (i32, i32) {
    %c0_i32 = arith.constant 0 : i32
    %c0_i32_0 = arith.constant 0 : i32
    return %arg0, %c0_i32 : i32, i32
  }
}

</mosaic_0001>

<bundles_post_ra>
// kernel: tpu_custom_call.1
= control target key start
LH: loop header
LB: loop body
LE: loop exit
PB: predicated region body
PF: predicated region fallthrough
CT: control target
= control target key end

     0   :  { %10 = vsyncpa [#allocation3], 0  ;;  %s1278_s0 = inlined_call_operand.vmem [shape: f32[32,17], index: 0, kind: input, shape index: {}]   ;;  %s1279_s1 = inlined_call_operand.vmem [shape: s32[32,1], index: 1, kind: input, shape index: {}]   ;;  %s1280_s2 = inlined_call_operand.vmem [shape: s32[1,544], index: 2, kind: input, shape index: {}]   ;;  %s1281_s3 = inlined_call_operand.vmem [shape: f32[17,544], index: 3, kind: input, shape index: {}]   ;;  %s1282_s4 = inlined_call_operand.vmem [shape: f32[544,32], index: 4, kind: input, shape index: {}]   ;;  %s1283_s5 = inlined_call_operand.hbm [shape: f32[32,32], index: 5, kind: output, shape index: {}]  }
   0x1   :  { %12 = vsyncpa [#allocation3 + $0x1], 0  ;;  %s908_s18 = smov 0   ;;  %s910_s19 = smov 0  }
   0x2   :  { %s912_s20 = smov 0   ;;  %s914_s21 = smov 0  }
   0x3 LB: > { %s929_s22 = sadd.s32 4294967295, %s873_s21   ;;  %s721_s23 = sadd.s32 4294967294, %s873_s21   ;;  %s873_s21 = sphi %s914_s21, %s1289_s21   ;;  %s869_s20 = sphi %s912_s20, %s1288_s20   ;;  %s865_s19 = sphi %s910_s19, %s1287_s19   ;;  %s861_s18 = sphi %s908_s18, %s1286_s18  }
   0x4   : > { %s933_s24 = sadd.s32 1, %s873_s21   ;;  %s140_s25 = sadd.s32 1, %s869_s20 }
   0x5   : > { %s137_s26 = ssub.s32 %s873_s21, %s933_s24  ;;  %p150_p0 = scmp.ne.s32.totalorder %s869_s20, %s865_s19 }
   0x6   : > { %p138_p1 = scmp.eq.s32.totalorder %s137_s26, 0  ;;  %p151_p2 = scmp.eq.s32.totalorder %s929_s22, 1 }
   0x7   : > { %p156_p3 = scmp.ne.s32.totalorder %s865_s19, %s861_s18  ;;  %p157_p4 = scmp.eq.s32.totalorder %s721_s23, 1 }
   0x8   : > { %s944_s27 = scalar_select %p138_p1, %s869_s20, %s140_s25  }
   0x9   : > { %p946_p5 = por %p151_p2, %p150_p0  ;;  %p950_p6 = por %p157_p4, %p156_p3 }
   0xa   : > { %p724_p7 = scmp.ge.s32.totalorder %s873_s21, 1  ;;  %p202_p8 = scmp.lt.s32.totalorder %s873_s21, 3 }
   0xc   : > { %p203_p9 = pnand %p724_p7, %p202_p8 }
   0xd   : > { %s726_s17 = sshll.u32 (!%p203_p9), %s929_s22, 1  ;;  %s760_s9 = sshll.u32 (!%p203_p9), %s929_s22, 4 }
   0xe   : > { %206 = sbr.rel (%p203_p9) target bundleno = 325 (0x145), region = 40  ;;  %p236_p10 = scmp.lt.s32.totalorder (!%p203_p9), %s726_s17, 3 }
   0xf   : > { %s643_s12 = scalar_lea.hbm (!%p203_p9), %s1283_s5, %s760_s9  ;;  %s831_s26 = scalar_lea.hbm (!%p203_p9), %s1283_s5, 32 }
  0x13   : > { %v260_v0 = vld [vmem:[%s1281_s3 + $0x50] sm:$0x1]  ;;  %vm272_vm0 = vcmask 1040384   ;;  %v261_v1 = vld [vmem:[%s1281_s3 + $0x58] sm:$0x1]  ;;  %v255_v2 = vld [vmem:[%s1281_s3 + $0x28] sm:$0xff] }
  0x14   : > { %730 = vmatpush.msk.msra.mxu0 %vm272_vm0, %v260_v0  ;;  %761 = vmatpush.msk.msra.mxu2 %vm272_vm0, %v260_v0  ;;  %v263_v3 = vld [vmem:[%s1281_s3 + $0x68] sm:$0x1]  ;;  %v256_v4 = vld [vmem:[%s1281_s3 + $0x30] sm:$0xff]  ;;  %v258_v5 = vld [vmem:[%s1281_s3 + $0x40] sm:$0xff]  ;;  %s1291_s17 = smov (!%p236_p10, %s726_s17), 3  ;;  %vm265_vm1 = vcmask 138240  }
  0x15   : > { %733 = vmatpush.msk.msra.mxu1 %vm272_vm0, %v261_v1  ;;  %739 = vmatpush.msk.msra.mxu3 %vm272_vm0, %v263_v3  ;;  %v250_v6 = vld [vmem:[%s1281_s3] sm:$0xff]  ;;  %v251_v7 = vld [vmem:[%s1281_s3 + $0x8] sm:$0xff]  ;;  %v253_v8 = vld [vmem:[%s1281_s3 + $0x18] sm:$0xff]  ;;  %s727_s14 = sshll.u32 %s1291_s17, 3  ;;  %v875_v16 = vmov 0   ;;  %vm505_vm10 = vcmask 261120  }
  0x16   : > { %302 = vmatpush.msra.mxu0 %v255_v2  ;;  %762 = vmatpush.msra.mxu2 %v255_v2  ;;  %v262_v9 = vld [vmem:[%s1281_s3 + $0x60] sm:$0x1]  ;;  %v264_v10 = vld [vmem:[%s1281_s3 + $0x70] sm:$0x1]  ;;  %v452_v11 = vld [vmem:[%s1282_s4 + $0x78] sm:$0xff]  ;;  %s239_s23 = scalar_lea.vmem %s1278_s0, %s727_s14  ;;  %s1008_s7 = scalar_lea.vmem %s1279_s1, %s727_s14 }
  0x17   : > { %325 = vmatpush.msra.mxu1 %v256_v4  ;;  %371 = vmatpush.msra.mxu3 %v258_v5  ;;  %v257_v12 = vld [vmem:[%s1281_s3 + $0x38] sm:$0xff]  ;;  %v248_v13 = vld [vmem:[%s239_s23] sm:$0xff]  ;;  %v1010_v14 = vld [vmem:[%s239_s23 + $0x8] sm:$0xff]  ;;  %s646_s14 = sshll.u32 %s643_s12, 4  ;;  %s647_s14 = int_to_ptr.hbm [resolvable:$true] %s646_s14 }
  0x18   : > { %303 = vmatpush.msra.mxu0 %v250_v6  ;;  %763 = vmatpush.msra.mxu2 %v250_v6  ;;  %v259_v15 = vld [vmem:[%s1281_s3 + $0x48] sm:$0xff]  ;;  %v404_v17 = vld [vmem:[%s1008_s7] sm:$0xff]  ;;  %v451_v18 = vld [vmem:[%s1282_s4 + $0x70] sm:$0xff]  ;;  %s825_s16 = sshra.s32 %s647_s14, 4  ;;  %s826_s16 = int_to_ptr.hbm [resolvable:$true] %s825_s16 }
  0x19   : > { %326 = vmatpush.msra.mxu1 %v251_v7  ;;  %372 = vmatpush.msra.mxu3 %v253_v8  ;;  %v252_v19 = vld [vmem:[%s1281_s3 + $0x10] sm:$0xff]  ;;  %v254_v20 = vld [vmem:[%s1281_s3 + $0x20] sm:$0xff]  ;;  %v468_v21 = vld [vmem:[%s1282_s4 + $0xf8] sm:$0xff]  ;;  %s827_s22 = scalar_lea.hbm %s826_s16, 16  ;;  %p832_p0 = scmp.lt.s32.totalorder %s826_s16, %s1283_s5 }
  0x1a   : > { %736 = vmatpush.msk.msrb.mxu2 %vm272_vm0, %v262_v9  ;;  %742 = vmatpush.msk.msrb.mxu0 %vm272_vm0, %v264_v10  ;;  %v450_v22 = vld [vmem:[%s1282_s4 + $0x68] sm:$0xff]  ;;  %v500_v23 = vld [vmem:[%s1282_s4 + $0x1f8] sm:$0xff]  ;;  %v467_v24 = vld [vmem:[%s1282_s4 + $0xf0] sm:$0xff]  ;;  %p828_p11 = scmp.ne.s32.totalorder %s826_s16, %s827_s22  ;;  %p833_p1 = scmp.lt.s32.totalorder %s831_s26, %s827_s22 }
  0x1b   : > { %810 = vset.pattern.permute.xlu0 %v875_v16  ;;  %512 = vmatpush.msrb.mxu1 %v452_v11  ;;  %v449_v25 = vld [vmem:[%s1282_s4 + $0x60] sm:$0xff]  ;;  %v484_v26 = vld [vmem:[%s1282_s4 + $0x178] sm:$0xff]  ;;  %v466_v27 = vld [vmem:[%s1282_s4 + $0xe8] sm:$0xff] }
  0x1c   : > { %731 = vmatmul.msk.f32.vlgmr.msra.gmra.mxu0 %vm265_vm1, %v248_v13  ;;  %732 = vmatmul.msk.f32.vlgmr.msra.gmra.mxu2 %vm265_vm1, %v1010_v14  ;;  %v448_v28 = vld [vmem:[%s1282_s4 + $0x58] sm:$0xff]  ;;  %v405_v29 = vld [vmem:[%s1008_s7 + $0x8] sm:$0xff]  ;;  %v499_v30 = vld [vmem:[%s1282_s4 + $0x1f0] sm:$0xff]  ;;  %s232_s7 = sand.u32 1, %s865_s19   ;;  %p829_p12 = pnand %p828_p11, %p946_p5 }
  0x1d   : > { %734 = vmatmul.msk.f32.vlgmr.msra.gmra.mxu1 %vm265_vm1, %v248_v13  ;;  %740 = vmatmul.msk.f32.vlgmr.msra.gmra.mxu3 %vm265_vm1, %v248_v13  ;;  %v465_v31 = vld [vmem:[%s1282_s4 + $0xe0] sm:$0xff]  ;;  %v447_v32 = vld [vmem:[%s1282_s4 + $0x50] sm:$0xff]  ;;  %v498_v33 = vld [vmem:[%s1282_s4 + $0x1e8] sm:$0xff]  ;;  %s725_s17 = sshll.u32 %s232_s7, 4  ;;  %s632_s15 = scalar_lea.sflag [#allocation3], %s232_s7 }
  0x1e   : > { %348 = vmatpush.msrb.mxu2 %v257_v12  ;;  %394 = vmatpush.msrb.mxu0 %v259_v15  ;;  %v483_v34 = vld [vmem:[%s1282_s4 + $0x170] sm:$0xff]  ;;  %v464_v35 = vld [vmem:[%s1282_s4 + $0xd8] sm:$0xff]  ;;  %v446_v36 = vld [vmem:[%s1282_s4 + $0x48] sm:$0xff]  ;;  %s234_s8 = scalar_lea.vmem [#allocation2], %s725_s17  ;;  %p830_p13 = pneg %p829_p12 }
  0x1f   : > { %412 = vperm.xlu0 %810, %v404_v17   ;;  %513 = vmatpush.msrb.mxu1 %v451_v18  ;;  %v497_v37 = vld [vmem:[%s1282_s4 + $0x1e0] sm:$0xff]  ;;  %v482_v38 = vld [vmem:[%s1282_s4 + $0x168] sm:$0xff]  ;;  %v463_v39 = vld [vmem:[%s1282_s4 + $0xd0] sm:$0xff]  ;;  %s644_s13 = sshll.u32 %s234_s8, 4  ;;  %p834_p2 = por %p833_p1, %p832_p0  ;;  %s645_s13 = int_to_ptr.vmem [resolvable:$true] %s644_s13 }
  0x20   : > { %349 = vmatpush.msrb.mxu2 %v252_v19  ;;  %395 = vmatpush.msrb.mxu0 %v254_v20  ;;  %v445_v40 = vld [vmem:[%s1282_s4 + $0x40] sm:$0xff]  ;;  %v496_v41 = vld [vmem:[%s1282_s4 + $0x1d8] sm:$0xff]  ;;  %v462_v43 = vld [vmem:[%s1282_s4 + $0xc8] sm:$0xff] }
  0x21   : > { %514 = vmatpush.msrb.mxu1 %v450_v22  ;;  %558 = vmatpush.msrb.mxu3 %v484_v26  ;;  %v481_v42 = vld [vmem:[%s1282_s4 + $0x160] sm:$0xff]  ;;  %v444_v44 = vld [vmem:[%s1282_s4 + $0x38] sm:$0xff]  ;;  %v495_v45 = vld [vmem:[%s1282_s4 + $0x1d0] sm:$0xff]  ;;  %p835_p3 = pnand %p834_p2, %p830_p13 }
  0x22   : > { %535 = vmatpush.msra.mxu2 %v468_v21  ;;  %581 = vmatpush.msra.mxu0 %v500_v23  ;;  %v480_v46 = vld [vmem:[%s1282_s4 + $0x158] sm:$0xff]  ;;  %v461_v47 = vld [vmem:[%s1282_s4 + $0xc0] sm:$0xff]  ;;  %v443_v48 = vld [vmem:[%s1282_s4 + $0x30] sm:$0xff] }
  0x23   : > { %515 = vmatpush.msrb.mxu1 %v449_v25  ;;  %559 = vmatpush.msrb.mxu3 %v483_v34  ;;  %v494_v49 = vld [vmem:[%s1282_s4 + $0x1c8] sm:$0xff]  ;;  %v479_v50 = vld [vmem:[%s1282_s4 + $0x150] sm:$0xff]  ;;  %v460_v51 = vld [vmem:[%s1282_s4 + $0xb8] sm:$0xff] }
  0x24   : > { %536 = vmatpush.msra.mxu2 %v467_v24  ;;  %743 = vmatmul.msk.f32.vlgmr.msrb.gmra.mxu0 %vm265_vm1, %v248_v13  ;;  %v442_v52 = vld [vmem:[%s1282_s4 + $0x28] sm:$0xff]  ;;  %v493_v53 = vld [vmem:[%s1282_s4 + $0x1c0] sm:$0xff]  ;;  %v459_v55 = vld [vmem:[%s1282_s4 + $0xb0] sm:$0xff] }
  0x25   : > { %737 = vmatmul.msk.f32.vlgmr.msrb.gmra.mxu2 %vm265_vm1, %v248_v13  ;;  %735 = vmatmul.msk.f32.gmra.mxu1 %vm265_vm1, %v1010_v14  ;;  %v478_v54 = vld [vmem:[%s1282_s4 + $0x148] sm:$0xff]  ;;  %v441_v56 = vld [vmem:[%s1282_s4 + $0x20] sm:$0xff]  ;;  %v492_v57 = vld [vmem:[%s1282_s4 + $0x1b8] sm:$0xff] }
  0x26   : > { %741 = vmatmul.msk.f32.gmra.mxu3 %vm265_vm1, %v1010_v14  ;;  %537 = vmatpush.msra.mxu2 %v466_v27  ;;  %v477_v58 = vld [vmem:[%s1282_s4 + $0x140] sm:$0xff]  ;;  %v458_v59 = vld [vmem:[%s1282_s4 + $0xa8] sm:$0xff]  ;;  %v440_v60 = vld [vmem:[%s1282_s4 + $0x18] sm:$0xff] }
  0x27   : > { %516 = vmatpush.msrb.mxu1 %v448_v28  ;;  %415 = vperm.xlu0 %810, %v405_v29   ;;  %v491_v61 = vld [vmem:[%s1282_s4 + $0x1b0] sm:$0xff]  ;;  %v457_v62 = vld [vmem:[%s1282_s4 + $0xa0] sm:$0xff]  ;;  %v490_v0 = vld [vmem:[%s1282_s4 + $0x1a8] sm:$0xff] }
  0x28   : > { %582 = vmatpush.msra.mxu0 %v499_v30  ;;  %538 = vmatpush.msra.mxu2 %v465_v31  ;;  %v439_v63 = vld [vmem:[%s1282_s4 + $0x10] sm:$0xff]  ;;  %v456_v1 = vld [vmem:[%s1282_s4 + $0x98] sm:$0xff]  ;;  %v438_v2 = vld [vmem:[%s1282_s4 + $0x8] sm:$0xff] }
  0x29   : > { %517 = vmatpush.msrb.mxu1 %v447_v32  ;;  %560 = vmatpush.msrb.mxu3 %v482_v38  ;;  %v489_v3 = vld [vmem:[%s1282_s4 + $0x1a0] sm:$0xff]  ;;  %v455_v4 = vld [vmem:[%s1282_s4 + $0x90] sm:$0xff]  ;;  %v454_v5 = vld [vmem:[%s1282_s4 + $0x88] sm:$0xff] }
  0x2a   : > { %583 = vmatpush.msra.mxu0 %v498_v33  ;;  %539 = vmatpush.msra.mxu2 %v464_v35  ;;  %v437_v6 = vld [vmem:[%s1282_s4] sm:$0xff]  ;;  %v476_v8 = vld [vmem:[%s1282_s4 + $0x138] sm:$0xff]  ;;  %v475_v10 = vld [vmem:[%s1282_s4 + $0x130] sm:$0xff] }
  0x2b   : > { %518 = vmatpush.msrb.mxu1 %v446_v36  ;;  %561 = vmatpush.msrb.mxu3 %v481_v42  ;;  %v453_v7 = vld [vmem:[%s1282_s4 + $0x80] sm:$0xff]  ;;  %v488_v9 = vld [vmem:[%s1282_s4 + $0x198] sm:$0xff]  ;;  %v487_v11 = vld [vmem:[%s1282_s4 + $0x190] sm:$0xff] }
  0x2c   : > { %584 = vmatpush.msra.mxu0 %v497_v37  ;;  %540 = vmatpush.msra.mxu2 %v463_v39  ;;  %v474_v12 = vld [vmem:[%s1282_s4 + $0x128] sm:$0xff]  ;;  %v485_v15 = vld [vmem:[%s1282_s4 + $0x180] sm:$0xff]  ;;  %v472_v16 = vld [vmem:[%s1282_s4 + $0x118] sm:$0xff] }
  0x2d   : > { %738 = vmatmul.msk.f32.gmra.mxu2 %vm265_vm1, %v1010_v14  ;;  %744 = vmatmul.msk.f32.gmra.mxu0 %vm265_vm1, %v1010_v14  ;;  %v486_v13 = vld [vmem:[%s1282_s4 + $0x188] sm:$0xff]  ;;  %v473_v14 = vld [vmem:[%s1282_s4 + $0x120] sm:$0xff]  ;;  %v471_v17 = vld [vmem:[%s1282_s4 + $0x110] sm:$0xff] }
  0x2e   : > { %519 = vmatpush.msrb.mxu1 %v445_v40  ;;  %585 = vmatpush.msra.mxu0 %v496_v41  ;;  %v504_v18 = vld [vmem:[%s1282_s4 + $0x218] sm:$0xff]  ;;  %v470_v19 = vld [vmem:[%s1282_s4 + $0x108] sm:$0xff]  ;;  %v503_v20 = vld [vmem:[%s1282_s4 + $0x210] sm:$0xff] }
  0x2f   : > { %541 = vmatpush.msra.mxu2 %v462_v43  ;;  %562 = vmatpush.msrb.mxu3 %v480_v46  ;;  %v469_v21 = vld [vmem:[%s1282_s4 + $0x100] sm:$0xff]  ;;  %v502_v22 = vld [vmem:[%s1282_s4 + $0x208] sm:$0xff] }
  0x30   : > { %520 = vmatpush.msrb.mxu1 %v444_v44  ;;  %586 = vmatpush.msra.mxu0 %v495_v45  ;;  %v501_v23 = vld [vmem:[%s1282_s4 + $0x200] sm:$0xff] }
  0x31   : > { %542 = vmatpush.msra.mxu2 %v461_v47  ;;  %563 = vmatpush.msrb.mxu3 %v479_v50  ;;  %v403_v24 = vld [vmem:[%s1280_s2] sm:$0x1f] }
  0x32   : > { %521 = vmatpush.msrb.mxu1 %v443_v48  ;;  %587 = vmatpush.msra.mxu0 %v494_v49  ;;  %v406_v26 = vperm.slane %v403_v24, 0  ;;  %v407_v27 = vperm.slane %v403_v24, 1  ;;  %v409_v30 = vperm.slane %v403_v24, 3  ;;  %v410_v34 = vperm.slane %v403_v24, 4 }
  0x33   : > { %543 = vmatpush.msra.mxu2 %v460_v51  ;;  %564 = vmatpush.msrb.mxu3 %v478_v54  ;;  %v408_v35 = vperm.slane %v403_v24, 2 }
  0x34   : > { %522 = vmatpush.msrb.mxu1 %v442_v52  ;;  %588 = vmatpush.msra.mxu0 %v493_v53 }
  0x35   : > { %544 = vmatpush.msra.mxu2 %v459_v55  ;;  %565 = vmatpush.msrb.mxu3 %v477_v58 }
  0x36   : > { %523 = vmatpush.msrb.mxu1 %v441_v56  ;;  %589 = vmatpush.msra.mxu0 %v492_v57 }
  0x37   : > { %545 = vmatpush.msra.mxu2 %v458_v59  ;;  %566 = vmatpush.msrb.mxu3 %v476_v8 }
  0x38   : > { %524 = vmatpush.msrb.mxu1 %v440_v60  ;;  %590 = vmatpush.msra.mxu0 %v491_v61 }
  0x39   : > { %546 = vmatpush.msra.mxu2 %v457_v62  ;;  %567 = vmatpush.msrb.mxu3 %v475_v10 }
  0x3a   : > { %525 = vmatpush.msrb.mxu1 %v439_v63  ;;  %591 = vmatpush.msra.mxu0 %v490_v0 }
  0x3b   : > { %547 = vmatpush.msra.mxu2 %v456_v1  ;;  %568 = vmatpush.msrb.mxu3 %v474_v12 }
  0x3c   : > { %526 = vmatpush.msrb.mxu1 %v438_v2  ;;  %592 = vmatpush.msra.mxu0 %v489_v3 }
  0x3d   : > { %548 = vmatpush.msra.mxu2 %v455_v4  ;;  %569 = vmatpush.msrb.mxu3 %v473_v14 }
  0x3e   : > { %527 = vmatpush.msrb.mxu1 %v437_v6  ;;  %593 = vmatpush.msra.mxu0 %v488_v9 }
  0x3f   : > { %549 = vmatpush.msra.mxu2 %v454_v5  ;;  %570 = vmatpush.msrb.mxu3 %v472_v16 }
  0x40   : > { %594 = vmatpush.msra.mxu0 %v487_v11  ;;  %616 = vmatpush.msra.mxu1 %v504_v18 }
  0x41   : > { %550 = vmatpush.msra.mxu2 %v453_v7  ;;  %571 = vmatpush.msrb.mxu3 %v471_v17 }
  0x42   : > { %595 = vmatpush.msra.mxu0 %v486_v13  ;;  %617 = vmatpush.msra.mxu1 %v503_v20 }
  0x43   : > { %572 = vmatpush.msrb.mxu3 %v470_v19 }
  0x44   : > { %596 = vmatpush.msra.mxu0 %v485_v15  ;;  %618 = vmatpush.msra.mxu1 %v502_v22 }
  0x45   : > { %573 = vmatpush.msrb.mxu3 %v469_v21 }
  0x46   : > { %619 = vmatpush.msra.mxu1 %v501_v23 }
  0x47   : > { %764 = vmatpush.msra.mxu3 %v504_v18 }
  0x49   : > { %765 = vmatpush.msra.mxu3 %v503_v20 }
  0x4b   : > { %766 = vmatpush.msra.mxu3 %v502_v22 }
  0x4d   : > { %767 = vmatpush.msra.mxu3 %v501_v23 }
  0x91   : > { %v413_v25 = vpop.permute.xlu0 %412 }
  0x92   : > { %vm417_vm2 = vcmp.eq.s32.totalorder %v406_v26, %v413_v25  ;;  %vm418_vm3 = vcmp.eq.s32.totalorder %v407_v27, %v413_v25  ;;  %vm420_vm4 = vcmp.eq.s32.totalorder %v409_v30, %v413_v25  ;;  %vm421_vm7 = vcmp.eq.s32.totalorder %v410_v34, %v413_v25 }
  0x93   : > { %vm419_vm8 = vcmp.eq.s32.totalorder %v408_v35, %v413_v25 }
  0x99   : > { %v305_v28 = vpop.f32.mrf.mxu0  ;;  %v416_v31 = vpop.permute.xlu0 %415 }
  0x9a   : > { %v328_v29 = vpop.f32.mrf.mxu1  ;;  %745 = vmatmul.msk.f32.vlgmr.msrb.gmra.mxu1 %vm417_vm2, %v305_v28  ;;  %vm422_vm5 = vcmp.eq.s32.totalorder %v406_v26, %v416_v31  ;;  %vm423_vm6 = vcmp.eq.s32.totalorder %v407_v27, %v416_v31  ;;  %vm425_vm9 = vcmp.eq.s32.totalorder %v409_v30, %v416_v31  ;;  %vm424_vm11 = vcmp.eq.s32.totalorder %v408_v35, %v416_v31 }
  0x9b   : > { %747 = vmatmul.msk.f32.vlgmr.msra.gmra.mxu2 %vm418_vm3, %v328_v29  ;;  %vm426_vm12 = vcmp.eq.s32.totalorder %v410_v34, %v416_v31 }
  0x9f   : > { %v308_v32 = vpop.f32.mrf.mxu2 }
  0xa0   : > { %v374_v33 = vpop.f32.mrf.mxu3 }
  0xa1   : > { %751 = vmatmul.msk.f32.vlgmr.msra.gmra.mxu0 %vm420_vm4, %v374_v33  ;;  %v397_v37 = vpop.f32.mrf.mxu0 }
  0xa2   : > { %v331_v36 = vpop.f32.mrf.mxu1  ;;  %746 = vmatmul.msk.f32.gmra.mxu1 %vm422_vm5, %v308_v32  ;;  %v431_v38 = vsel %vm421_vm7, %v397_v37, 0.0 }
  0xa3   : > { %748 = vmatmul.msk.f32.gmra.mxu2 %vm423_vm6, %v331_v36 }
  0xa8   : > { %v351_v39 = vpop.f32.mrf.mxu2 }
  0xa9   : > { %v377_v40 = vpop.f32.mrf.mxu3  ;;  %749 = vmatmul.msk.f32.vlgmr.msrb.gmra.mxu3 %vm419_vm8, %v351_v39 }
  0xaa   : > { %752 = vmatmul.msk.f32.gmra.mxu0 %vm425_vm9, %v377_v40  ;;  %753 = vmatmul.msk.f32.vlgmr.msra.gmra.mxu1 %vm505_vm10, %v431_v38  ;;  %v400_v42 = vpop.f32.mrf.mxu0 }
  0xab   : > { %v436_v43 = vsel %vm426_vm12, %v400_v42, 0.0 }
  0xb0   : > { %v354_v41 = vpop.f32.mrf.mxu2 }
  0xb1   : > { %750 = vmatmul.msk.f32.gmra.mxu3 %vm424_vm11, %v354_v41 }
  0xb9   : > { %754 = vmatmul.msk.f32.vlgmr.msra.gmra.mxu3 %vm505_vm10, %v436_v43 }
 0x117   : > { %v529_v44 = vpop.f32.mrf.mxu1 }
 0x11e   : > { %v552_v46 = vpop.f32.mrf.mxu2  ;;  %v598_v50 = vpop.f32.mrf.mxu0 }
 0x11f   : > { %v532_v45 = vpop.f32.mrf.mxu1  ;;  %v553_v47 = vadd.f32 %v552_v46, %v529_v44 }
 0x126   : > { %v555_v54 = vpop.f32.mrf.mxu2 }
 0x127   : > { %v621_v52 = vpop.f32.mrf.mxu1  ;;  %v556_v57 = vadd.f32 %v555_v54, %v532_v45  ;;  %v601_v59 = vpop.f32.mrf.mxu0 }
 0x12c   : > { %v575_v48 = vpop.f32.mrf.mxu3 }
 0x12d   : > { %v576_v49 = vadd.f32 %v575_v48, %v553_v47 }
 0x12f   : > { %v599_v51 = vadd.f32 %v598_v50, %v576_v49 }
 0x131   : > { %v622_v53 = vadd.f32 %v621_v52, %v599_v51 }
 0x133   : > { %v627_v55 = vmax.f32 %v622_v53, 0.0 }
 0x134   : > { %v578_v56 = vpop.f32.mrf.mxu3 }
 0x135   : > { %629 = vst.msk [vmem:[%s234_s8] sm:$0xff] %vm505_vm10, %v627_v55  ;;  %v579_v58 = vadd.f32 %v578_v56, %v556_v57 }
 0x137   : > { %v602_v60 = vadd.f32 %v601_v59, %v579_v58 }
 0x13c   : > { %v624_v61 = vpop.f32.mrf.mxu3 }
 0x13d   : > { %v625_v62 = vadd.f32 %v624_v61, %v602_v60 }
 0x13f   : > { %v628_v63 = vmax.f32 %v625_v62, 0.0 }
 0x141   : > { %630 = vst.msk [vmem:[%s234_s8 + $0x8] sm:$0xff] %vm505_vm10, %v628_v63 }
 0x142   : > { %838 = shalt.err (!%p835_p3)
}
 0x143   : > { %s876_s7 = smov 128   ;;  %s877_s17 = smov 8  }
 0x144   : > { %768 = dma.vmem_to_hbm [thread:$0]  (%p946_p5), %s645_s13, 256, %s647_s14, %s632_s15, %s876_s7, %s876_s7, %s877_s17  }
 0x145 PF: > { %p774_p4 = scmp.ge.s32.totalorder %s873_s21, 2  ;;  %s661_s8 = sand.u32 1, %s861_s18  }
 0x146   : > { %s662_s9 = scalar_lea.sflag [#allocation3], %s661_s8 }
 0x147   : > { %p771_p7 = pnand %p774_p4, %p950_p6 }
 0x149   : > { %p772_p8 = pneg %p771_p7 }
 0x14b   : > { %856 = dma.done.wait (%p772_p8), %s662_s9, 256  }
 0x14c   : > { %858 = vsyncadd (%p772_p8), %s662_s9, 4294967040  ;;  %p15_p9 = scmp.ge.s32.totalorder %s933_s24, 4   ;;  %s1286_s18 = smov %s865_s19 }
 0x14d   : > { %s1287_s19 = smov %s869_s20  ;;  %s1288_s20 = smov %s944_s27 }
 0x14e   : > { %s1289_s21 = smov %s933_s24  ;;  %17 = sbr.rel (!%p15_p9) target bundleno = 3 (0x3), region = 78 }
 0x153   :  { %668 = vsyncpa [#allocation3], 1 }
 0x154   :  { %670 = vsyncpa [#allocation3 + $0x1], 1 }

</bundles_post_ra>
